<compile_context>
chip_gen: v6e
topology: v6e:2x2x1
jax: 0.10.0
libtpu: 0.0.40
codegen_flags: <defaults>
</compile_context>

<pallas_src>
import jax
import jax.numpy as jnp
from jax.experimental import pallas as pl
from jax.experimental.pallas import tpu as pltpu


def encoder_lstm_kernel(tok_ref, x_ref, h0_ref, c0_ref, w_ref, b_ref,
                        out_ref, hc_ref):
    """One LSTM time-step per grid iteration; state carried in hc_ref (resident)."""
    del tok_ref  # gather already done by the embedding index_map
    H = h0_ref.shape[-1]
    t = pl.program_id(0)

    # initialize the carried state from the provided hidden on the first step
    @pl.when(t == 0)
    def _():
        hc_ref[0:1, :] = h0_ref[...]
        hc_ref[1:2, :] = c0_ref[...]

    x = x_ref[0]                 # (1, H) embedding row (gathered via index_map)
    h = hc_ref[0:1, :]           # (1, H)
    c = hc_ref[1:2, :]           # (1, H)

    # fused gate matmul: [x ; h] @ [W_ih^T ; W_hh^T] + (b_ih + b_hh)
    xh = jnp.concatenate([x, h], axis=-1)                       # (1, 2H)
    gates = (jnp.dot(xh, w_ref[...], preferred_element_type=jnp.float32)
             + b_ref[...])                                      # (1, 4H)

    i_g = jax.nn.sigmoid(gates[:, 0:H])
    f_g = jax.nn.sigmoid(gates[:, H:2 * H])
    g_g = jnp.tanh(gates[:, 2 * H:3 * H])
    o_g = jax.nn.sigmoid(gates[:, 3 * H:4 * H])

    c_new = f_g * c + i_g * g_g
    h_new = o_g * jnp.tanh(c_new)

    out_ref[0] = h_new           # per-step LSTM output
    hc_ref[0:1, :] = h_new       # carry state to the next grid step
    hc_ref[1:2, :] = c_new


def encoder_rnn_forward(tokens, hidden, params):
    """tokens: int32 (T,); hidden: (h, c) each (1,1,H).

    Returns (output (T,1,H), (h (1,1,H), c (1,1,H))).  T=1 matches the PyTorch
    EncoderRNN.forward exactly; T>1 is the same module applied sequentially
    inside one kernel (weights resident, state in VMEM).
    """
    emb_table, w_packed, b = params
    vocab, H = emb_table.shape
    T = tokens.shape[0]

    # VMEM refs have no OOB checks -> clamp token ids before they drive a DMA.
    tokens = jnp.clip(tokens.astype(jnp.int32), 0, vocab - 1)

    h0 = hidden[0].reshape(1, H).astype(jnp.float32)
    c0 = hidden[1].reshape(1, H).astype(jnp.float32)
    emb3 = emb_table.reshape(vocab, 1, H)   # leading gather dim, (1,H) tile

    grid_spec = pltpu.PrefetchScalarGridSpec(
        num_scalar_prefetch=1,
        grid=(T,),
        in_specs=[
            # gather exactly the row for token t (index_map sees prefetched ids)
            pl.BlockSpec((1, 1, H), lambda t, tok: (tok[t], 0, 0)),
            pl.BlockSpec((1, H), lambda t, tok: (0, 0)),          # h0
            pl.BlockSpec((1, H), lambda t, tok: (0, 0)),          # c0
            pl.BlockSpec((2 * H, 4 * H), lambda t, tok: (0, 0)),  # [W_ih^T; W_hh^T] (resident)
            pl.BlockSpec((1, 4 * H), lambda t, tok: (0, 0)),      # fused bias (resident)
        ],
        out_specs=[
            pl.BlockSpec((1, 1, H), lambda t, tok: (t, 0, 0)),    # per-step output
            pl.BlockSpec((2, H), lambda t, tok: (0, 0)),          # packed (h, c), resident
        ],
    )

    out_seq, hc = pl.pallas_call(
        encoder_lstm_kernel,
        out_shape=(
            jax.ShapeDtypeStruct((T, 1, H), jnp.float32),
            jax.ShapeDtypeStruct((2, H), jnp.float32),
        ),
        grid_spec=grid_spec,
        compiler_params=pltpu.CompilerParams(
            dimension_semantics=("arbitrary",)),   # sequential state carry
    )(tokens, emb3, h0, c0, w_packed, b)

    h_new = hc[0:1].reshape(1, 1, H)
    c_new = hc[1:2].reshape(1, 1, H)
    return out_seq, (h_new, c_new)   # out_seq already (seq, batch=1, H)


def reference_forward(tokens, hidden, params):
    """Pure-JAX reference matching torch.nn.LSTM applied token-by-token."""
    emb_table, w_packed, b = params
    H = emb_table.shape[1]
    h = hidden[0].reshape(1, H)
    c = hidden[1].reshape(1, H)
    outs = []
    for t in range(tokens.shape[0]):
        x = emb_table[tokens[t]].reshape(1, H)
        gates = jnp.concatenate([x, h], axis=-1) @ w_packed + b
        i_g = jax.nn.sigmoid(gates[:, 0:H])
        f_g = jax.nn.sigmoid(gates[:, H:2 * H])
        g_g = jnp.tanh(gates[:, 2 * H:3 * H])
        o_g = jax.nn.sigmoid(gates[:, 3 * H:4 * H])
        c = f_g * c + i_g * g_g
        h = o_g * jnp.tanh(c)
        outs.append(h)
    out = jnp.stack(outs, axis=0).reshape(-1, 1, H)
    return out, (h.reshape(1, 1, H), c.reshape(1, 1, H))


def init_params(key, vocab_size, hidden_size, condition_size):
    H = hidden_size + condition_size
    k_emb, k_wih, k_whh, k_bih, k_bhh = jax.random.split(key, 5)
    bound = 1.0 / jnp.sqrt(H)
    emb_table = jax.random.normal(k_emb, (vocab_size, H), jnp.float32)
    w_ih = jax.random.uniform(k_wih, (4 * H, H), jnp.float32, -bound, bound)
    w_hh = jax.random.uniform(k_whh, (4 * H, H), jnp.float32, -bound, bound)
    b_ih = jax.random.uniform(k_bih, (4 * H,), jnp.float32, -bound, bound)
    b_hh = jax.random.uniform(k_bhh, (4 * H,), jnp.float32, -bound, bound)
    # pre-pack for the kernel: stacked transposed weights + fused bias row
    w_packed = jnp.concatenate([w_ih.T, w_hh.T], axis=0)   # (2H, 4H)
    b = (b_ih + b_hh).reshape(1, 4 * H)
    return emb_table, w_packed, b


if __name__ == "__main__":
    vocab_size, hidden_size, condition_size = 16, 24, 8
    H = hidden_size + condition_size  # 32

    key = jax.random.PRNGKey(0)
    params = init_params(key, vocab_size, hidden_size, condition_size)

    h0 = jnp.zeros((1, 1, H), jnp.float32)   # initHidden (LSTM-sized; see note)
    c0 = jnp.zeros((1, 1, H), jnp.float32)

    # 1) single-token call: exact semantics of EncoderRNN.forward
    tok1 = jnp.array([5], dtype=jnp.int32)
    out1, (h1, c1) = encoder_rnn_forward(tok1, (h0, c0), params)
    jax.block_until_ready((out1, h1, c1))
    r_out1, (r_h1, r_c1) = reference_forward(tok1, (h0, c0), params)
    assert jnp.allclose(out1, r_out1, atol=1e-5), "single-step output mismatch"
    assert jnp.allclose(h1, r_h1, atol=1e-5), "single-step hidden mismatch"
    assert jnp.allclose(c1, r_c1, atol=1e-5), "single-step cell mismatch"

    # 2) full sequence in one pallas_call (amortizes weight DMA + launch overhead)
    toks = jax.random.randint(jax.random.PRNGKey(1), (8,), 0, vocab_size,
                              dtype=jnp.int32)
    out_s, (h_s, c_s) = encoder_rnn_forward(toks, (h0, c0), params)
    jax.block_until_ready((out_s, h_s, c_s))
    r_out_s, (r_h_s, r_c_s) = reference_forward(toks, (h0, c0), params)
    assert jnp.allclose(out_s, r_out_s, atol=1e-5), "sequence output mismatch"
    assert jnp.allclose(h_s, r_h_s, atol=1e-5), "sequence hidden mismatch"
    assert jnp.allclose(c_s, r_c_s, atol=1e-5), "sequence cell mismatch"

    # TODO(synk): batching (B,H) rows / padding 4H to the 256-wide MXU only pays
    # off once the workload is batched; left at the module's batch=1 semantics.
    print("KERNEL_OK")
</pallas_src>

<mosaic_0001>
module attributes {stable_mosaic.version = 11 : i64} {
  func.func @encoder_lstm_kernel(%arg0: i32, %arg1: memref<1xi32, #tpu.memory_space<smem>>, %arg2: memref<1x1x32xf32, #tpu.memory_space<vmem>>, %arg3: memref<1x32xf32, #tpu.memory_space<vmem>>, %arg4: memref<1x32xf32, #tpu.memory_space<vmem>>, %arg5: memref<64x128xf32, #tpu.memory_space<vmem>>, %arg6: memref<1x128xf32, #tpu.memory_space<vmem>>, %arg7: memref<1x1x32xf32, #tpu.memory_space<vmem>>, %arg8: memref<2x32xf32, #tpu.memory_space<vmem>>) attributes {dimension_semantics = [#tpu.dimension_semantics<arbitrary>], iteration_bounds = array<i64: 1>, scalar_prefetch = 1 : i64, scratch_operands = 0 : i64, tpu.core_type = #tpu.core_type<tc>, window_params = [{transform_indices = @transform_0, window_bounds = array<i64: 1, 1, 32>}, {pipeline_mode = #tpu.pipeline_mode<synchronous>, transform_indices = @transform_1, window_bounds = array<i64: 1, 32>}, {pipeline_mode = #tpu.pipeline_mode<synchronous>, transform_indices = @transform_2, window_bounds = array<i64: 1, 32>}, {pipeline_mode = #tpu.pipeline_mode<synchronous>, transform_indices = @transform_3, window_bounds = array<i64: 64, 128>}, {pipeline_mode = #tpu.pipeline_mode<synchronous>, transform_indices = @transform_4, window_bounds = array<i64: 1, 128>}, {transform_indices = @transform_5, window_bounds = array<i64: 1, 1, 32>}, {pipeline_mode = #tpu.pipeline_mode<synchronous>, transform_indices = @transform_6, window_bounds = array<i64: 2, 32>}]} {
    %c0_i32 = arith.constant 0 : i32
    %0 = arith.cmpi eq, %arg0, %c0_i32 : i32
    %1 = arith.extui %0 : i1 to i32
    %c0_i32_0 = arith.constant 0 : i32
    %2 = arith.cmpi ne, %1, %c0_i32_0 : i32
    scf.if %2 {
      %c0_20 = arith.constant 0 : index
      %c0_21 = arith.constant 0 : index
      %42 = vector.load %arg3[%c0_20, %c0_21] : memref<1x32xf32, #tpu.memory_space<vmem>>, vector<1x32xf32>
      %c0_22 = arith.constant 0 : index
      %c0_23 = arith.constant 0 : index
      %43 = vector.load %arg8[%c0_22, %c0_23] : memref<2x32xf32, #tpu.memory_space<vmem>>, vector<1x32xf32>
      tpu.vector_store %arg8[%c0_22, %c0_23], %42 {strides = array<i32>} : memref<2x32xf32, #tpu.memory_space<vmem>>, vector<1x32xf32>,
      %c0_24 = arith.constant 0 : index
      %c0_25 = arith.constant 0 : index
      %44 = vector.load %arg4[%c0_24, %c0_25] : memref<1x32xf32, #tpu.memory_space<vmem>>, vector<1x32xf32>
      %c1_26 = arith.constant 1 : index
      %c0_27 = arith.constant 0 : index
      %45 = vector.load %arg8[%c1_26, %c0_27] : memref<2x32xf32, #tpu.memory_space<vmem>>, vector<1x32xf32>
      tpu.vector_store %arg8[%c1_26, %c0_27], %44 {strides = array<i32>} : memref<2x32xf32, #tpu.memory_space<vmem>>, vector<1x32xf32>,
    } else {
    }
    %c0 = arith.constant 0 : index
    %c0_1 = arith.constant 0 : index
    %c0_2 = arith.constant 0 : index
    %3 = vector.load %arg2[%c0, %c0_1, %c0_2] : memref<1x1x32xf32, #tpu.memory_space<vmem>>, vector<1x1x32xf32>
    %4 = vector.shape_cast %3 : vector<1x1x32xf32> to vector<1x32xf32>
    %c0_3 = arith.constant 0 : index
    %c0_4 = arith.constant 0 : index
    %5 = vector.load %arg8[%c0_3, %c0_4] : memref<2x32xf32, #tpu.memory_space<vmem>>, vector<1x32xf32>
    %c1 = arith.constant 1 : index
    %c0_5 = arith.constant 0 : index
    %6 = vector.load %arg8[%c1, %c0_5] : memref<2x32xf32, #tpu.memory_space<vmem>>, vector<1x32xf32>
    %7 = tpu.concatenate %4, %5 in 1 : vector<1x32xf32>, vector<1x32xf32> -> vector<1x64xf32>
    %c0_6 = arith.constant 0 : index
    %c0_7 = arith.constant 0 : index
    %8 = vector.load %arg5[%c0_6, %c0_7] : memref<64x128xf32, #tpu.memory_space<vmem>>, vector<64x128xf32>
    %cst = arith.constant dense<0.000000e+00> : vector<1x128xf32>
    %9 = tpu.matmul %7, %8, %cst {dimension_numbers = #tpu.dot_dimension_numbers<[1], [0], [0], [1], [0, 0, 1, 1], [], []>} : vector<1x64xf32>, vector<64x128xf32>, vector<1x128xf32> -> vector<1x128xf32>
    %c0_8 = arith.constant 0 : index
    %c0_9 = arith.constant 0 : index
    %10 = vector.load %arg6[%c0_8, %c0_9] : memref<1x128xf32, #tpu.memory_space<vmem>>, vector<1x128xf32>
    %11 = arith.addf %9, %10 : vector<1x128xf32>
    %12 = vector.extract_strided_slice %11 {offsets = [0, 0], sizes = [1, 32], strides = [1, 1]} : vector<1x128xf32> to vector<1x32xf32>
    %13 = arith.negf %12 : vector<1x32xf32>
    %14 = math.exp %13 : vector<1x32xf32>
    %cst_10 = arith.constant 1.000000e+00 : f32
    %15 = vector.broadcast %cst_10 : f32 to vector<1x32xf32>
    %16 = arith.addf %15, %14 : vector<1x32xf32>
    %17 = arith.divf %15, %16 : vector<1x32xf32>
    %18 = vector.extract_strided_slice %11 {offsets = [0, 32], sizes = [1, 32], strides = [1, 1]} : vector<1x128xf32> to vector<1x32xf32>
    %19 = arith.negf %18 : vector<1x32xf32>
    %20 = math.exp %19 : vector<1x32xf32>
    %cst_11 = arith.constant 1.000000e+00 : f32
    %21 = vector.broadcast %cst_11 : f32 to vector<1x32xf32>
    %22 = arith.addf %21, %20 : vector<1x32xf32>
    %23 = arith.divf %21, %22 : vector<1x32xf32>
    %24 = vector.extract_strided_slice %11 {offsets = [0, 64], sizes = [1, 32], strides = [1, 1]} : vector<1x128xf32> to vector<1x32xf32>
    %25 = math.tanh %24 : vector<1x32xf32>
    %26 = vector.extract_strided_slice %11 {offsets = [0, 96], sizes = [1, 32], strides = [1, 1]} : vector<1x128xf32> to vector<1x32xf32>
    %27 = arith.negf %26 : vector<1x32xf32>
    %28 = math.exp %27 : vector<1x32xf32>
    %cst_12 = arith.constant 1.000000e+00 : f32
    %29 = vector.broadcast %cst_12 : f32 to vector<1x32xf32>
    %30 = arith.addf %29, %28 : vector<1x32xf32>
    %31 = arith.divf %29, %30 : vector<1x32xf32>
    %32 = arith.mulf %23, %6 : vector<1x32xf32>
    %33 = arith.mulf %17, %25 : vector<1x32xf32>
    %34 = arith.addf %32, %33 : vector<1x32xf32>
    %35 = math.tanh %34 : vector<1x32xf32>
    %36 = arith.mulf %31, %35 : vector<1x32xf32>
    %c0_13 = arith.constant 0 : index
    %c0_14 = arith.constant 0 : index
    %c0_15 = arith.constant 0 : index
    %37 = vector.load %arg7[%c0_13, %c0_14, %c0_15] : memref<1x1x32xf32, #tpu.memory_space<vmem>>, vector<1x1x32xf32>
    %38 = vector.shape_cast %37 : vector<1x1x32xf32> to vector<1x32xf32>
    %39 = vector.shape_cast %36 : vector<1x32xf32> to vector<1x1x32xf32>
    tpu.vector_store %arg7[%c0_13, %c0_14, %c0_15], %39 {strides = array<i32>} : memref<1x1x32xf32, #tpu.memory_space<vmem>>, vector<1x1x32xf32>,
    %c0_16 = arith.constant 0 : index
    %c0_17 = arith.constant 0 : index
    %40 = vector.load %arg8[%c0_16, %c0_17] : memref<2x32xf32, #tpu.memory_space<vmem>>, vector<1x32xf32>
    tpu.vector_store %arg8[%c0_16, %c0_17], %36 {strides = array<i32>} : memref<2x32xf32, #tpu.memory_space<vmem>>, vector<1x32xf32>,
    %c1_18 = arith.constant 1 : index
    %c0_19 = arith.constant 0 : index
    %41 = vector.load %arg8[%c1_18, %c0_19] : memref<2x32xf32, #tpu.memory_space<vmem>>, vector<1x32xf32>
    tpu.vector_store %arg8[%c1_18, %c0_19], %34 {strides = array<i32>} : memref<2x32xf32, #tpu.memory_space<vmem>>, vector<1x32xf32>,
    return
  }
  func.func @transform_0(%arg0: i32, %arg1: memref<1xi32, #tpu.memory_space<smem>>) -> (i32, i32, i32) {
    %0 = arith.index_cast %arg0 : i32 to index
    %1 = memref.load %arg1[%0] : memref<1xi32, #tpu.memory_space<smem>>
    %c0_i32 = arith.constant 0 : i32
    %c0_i32_0 = arith.constant 0 : i32
    %c0_i32_1 = arith.constant 0 : i32
    return %1, %c0_i32, %c0_i32_0 : i32, i32, i32
  }
  func.func @transform_1(%arg0: i32, %arg1: memref<1xi32, #tpu.memory_space<smem>>) -> (i32, i32) {
    %c0_i32 = arith.constant 0 : i32
    %c0_i32_0 = arith.constant 0 : i32
    %c0_i32_1 = arith.constant 0 : i32
    return %c0_i32, %c0_i32_0 : i32, i32
  }
  func.func @transform_2(%arg0: i32, %arg1: memref<1xi32, #tpu.memory_space<smem>>) -> (i32, i32) {
    %c0_i32 = arith.constant 0 : i32
    %c0_i32_0 = arith.constant 0 : i32
    %c0_i32_1 = arith.constant 0 : i32
    return %c0_i32, %c0_i32_0 : i32, i32
  }
  func.func @transform_3(%arg0: i32, %arg1: memref<1xi32, #tpu.memory_space<smem>>) -> (i32, i32) {
    %c0_i32 = arith.constant 0 : i32
    %c0_i32_0 = arith.constant 0 : i32
    %c0_i32_1 = arith.constant 0 : i32
    return %c0_i32, %c0_i32_0 : i32, i32
  }
  func.func @transform_4(%arg0: i32, %arg1: memref<1xi32, #tpu.memory_space<smem>>) -> (i32, i32) {
    %c0_i32 = arith.constant 0 : i32
    %c0_i32_0 = arith.constant 0 : i32
    %c0_i32_1 = arith.constant 0 : i32
    return %c0_i32, %c0_i32_0 : i32, i32
  }
  func.func @transform_5(%arg0: i32, %arg1: memref<1xi32, #tpu.memory_space<smem>>) -> (i32, i32, i32) {
    %c0_i32 = arith.constant 0 : i32
    %c0_i32_0 = arith.constant 0 : i32
    %c0_i32_1 = arith.constant 0 : i32
    return %arg0, %c0_i32, %c0_i32_0 : i32, i32, i32
  }
  func.func @transform_6(%arg0: i32, %arg1: memref<1xi32, #tpu.memory_space<smem>>) -> (i32, i32) {
    %c0_i32 = arith.constant 0 : i32
    %c0_i32_0 = arith.constant 0 : i32
    %c0_i32_1 = arith.constant 0 : i32
    return %c0_i32, %c0_i32_0 : i32, i32
  }
}

</mosaic_0001>

<bundles_post_ra>
// kernel: tpu_custom_call.1
= control target key start
LH: loop header
LB: loop body
LE: loop exit
PB: predicated region body
PF: predicated region fallthrough
CT: control target
= control target key end

     0   :  { %14 = vsyncpa [#allocation5], 0  ;;  %s459_s0 = inlined_call_operand.<no memory space> [shape: s32[1], index: 0, kind: input, shape index: {}]   ;;  %s460_s1 = inlined_call_operand.hbm [shape: f32[16,1,32], index: 1, kind: input, shape index: {}]   ;;  %s461_s2 = inlined_call_operand.vmem [shape: f32[1,32], index: 2, kind: input, shape index: {}]   ;;  %s462_s3 = inlined_call_operand.vmem [shape: f32[1,32], index: 3, kind: input, shape index: {}]   ;;  %s463_s4 = inlined_call_operand.hbm [shape: f32[64,128], index: 4, kind: input, shape index: {}]   ;;  %s464_s5 = inlined_call_operand.vmem [shape: f32[1,128], index: 5, kind: input, shape index: {}]   ;;  %s465_s6 = inlined_call_operand.hbm [shape: f32[1,1,32], index: 6, kind: output, shape index: {0}]   ;;  %s466_s7 = inlined_call_operand.hbm [shape: f32[2,32], index: 7, kind: output, shape index: {1}]  }
   0x1   :  { %15 = vsyncpa [#allocation8], 0 }
   0x2   :  { %16 = vsyncpa [#allocation6], 0 }
   0x3   :  { %17 = vsyncpa [#allocation11], 0  ;;  %s229_s26 = sshll.u32 %s459_s0, 4  ;;  %s369_s30 = smov [#allocation4]  }
   0x4   :  { %s25_s29 = scalar_lea.hbm %s460_s1, %s229_s26  ;;  %s27_s8 = sshll.u32 %s369_s30, 4  ;;  %s28_s8 = int_to_ptr.vmem [resolvable:$true] %s27_s8 }
   0x5   :  { %s279_s9 = scalar_lea.hbm %s25_s29, 16  ;;  %s281_s12 = scalar_lea.hbm %s460_s1, 256 }
   0x6   :  { %p280_p0 = scmp.ne.s32.totalorder %s25_s29, %s279_s9  ;;  %p282_p1 = scmp.lt.s32.totalorder %s25_s29, %s460_s1 }
   0x7   :  { %p283_p2 = scmp.lt.s32.totalorder %s281_s12, %s279_s9 }
   0x9   :  { %p284_p3 = por %p283_p2, %p282_p1 }
   0xb   :  { %p285_p4 = pnand %p284_p3, %p280_p0 }
   0xd   :  { %288 = shalt.err (!%p285_p4)
}
   0xe   :  { %s289_s0 = scalar_lea.vmem %s28_s8, 16  ;;  %s293_s15 = scalar_lea.vmem %s28_s8, 32 }
   0xf   :  { %p290_p5 = scmp.ne.s32.totalorder %s28_s8, %s289_s0  ;;  %p294_p6 = scmp.lt.s32.totalorder %s28_s8, %s28_s8 }
  0x10   :  { %p295_p7 = scmp.lt.s32.totalorder %s293_s15, %s289_s0 }
  0x12   :  { %p296_p8 = por %p295_p7, %p294_p6 }
  0x14   :  { %p297_p9 = pnand %p296_p8, %p290_p5 }
  0x16   :  { %300 = shalt.err (!%p297_p9)
}
  0x17   :  { %30 = dma.hbm_to_vmem [thread:$0]  %s25_s29, 16, %s28_s8, [#allocation5]  }
  0x18   :  { %s370_s16 = smov [#allocation7]  }
  0x19   :  { %s40_s17 = sshll.u32 %s370_s16, 4  ;;  %s41_s17 = int_to_ptr.vmem [resolvable:$true] %s40_s17 }
  0x1a   :  { %s309_s18 = scalar_lea.vmem %s41_s17, 1024  ;;  %p314_p11 = scmp.lt.s32.totalorder %s41_s17, %s41_s17 }
  0x1b   :  { %p310_p10 = scmp.ne.s32.totalorder %s41_s17, %s309_s18  ;;  %p315_p12 = scmp.lt.s32.totalorder %s309_s18, %s309_s18 }
  0x1d   :  { %p316_p13 = por %p315_p12, %p314_p11 }
  0x1f   :  { %p317_p1 = pnand %p316_p13, %p310_p10 }
  0x21   :  { %320 = shalt.err (!%p317_p1)
}
  0x22   :  { %s371_s1 = smov 128   ;;  %s372_s19 = smov 8  }
  0x23   :  { %46 = dma.hbm_to_vmem [thread:$0]  %s463_s4, 1024, %s41_s17, [#allocation8], %s371_s1, %s371_s1, %s372_s19  }
  0x24   :  { %361 = dma.done.wait [#allocation5], 16  }
  0x25   :  { %362 = vsyncadd [#allocation5], 4294967280 }
  0x26   :  { %363 = dma.done.wait [#allocation8], 1024  }
  0x27   :  { %364 = vsyncadd [#allocation8], 4294966272  ;;  %v373_v0 = vmov 0.0   ;;  %vm374_vm0 = vmmov 0   ;;  %vm61_vm1 = vcmask 253952   ;;  %v81_v2 = vld [vmem:[#allocation7 + $0x38] sm:$0xff] }
  0x28   :  { %241 = vmatprep.subr.mxu0 %v373_v0  ;;  %257 = vmatprep.mubr.msk.f32.mxu0 %vm374_vm0, %v373_v0  ;;  %v60_v1 = vld [vmem:[%s461_s2] sm:$0x1]  ;;  %v80_v3 = vld [vmem:[#allocation7 + $0x30] sm:$0xff]  ;;  %v79_v4 = vld [vmem:[#allocation7 + $0x28] sm:$0xff]  ;;  %s375_s2 = smov 32   ;;  %vm72_vm2 = vcmask 261120  }
  0x29   :  { %62 = vst.msk [vmem:[#allocation10] sm:$0x1] %vm61_vm1, %v60_v1  ;;  %242 = vmatpush3.msra.mxu0 %v81_v2  ;;  %v63_v5 = vld [vmem:[%s462_s3] sm:$0x1]  ;;  %v78_v6 = vld [vmem:[#allocation7 + $0x20] sm:$0xff]  ;;  %v76_v9 = vld [vmem:[#allocation7 + $0x10] sm:$0xff] }
  0x2a   :  { %243 = vmatprep.subr.mxu0 %v373_v0  ;;  %64 = vst.msk [vmem:[#allocation10 + $0x1] sm:$0x1] %vm61_vm1, %v63_v5  ;;  %v77_v7 = vld [vmem:[#allocation7 + $0x18] sm:$0xff]  ;;  %v75_v10 = vld [vmem:[#allocation7 + $0x8] sm:$0xff]  ;;  %v74_v12 = vld [vmem:[#allocation7] sm:$0xff]  ;;  %vm83_vm3 = vcmask 523264  }
  0x2b   :  { %244 = vmatpush3.msra.mxu0 %v80_v3  ;;  %v65_v13 = vld [vmem:[#allocation4] sm:$0x1]  ;;  %s376_s26 = smov 64   ;;  %s378_s27 = smov [#allocation9]  }
  0x2c   :  { %245 = vmatprep.subr.mxu0 %v373_v0  ;;  %v82_v16 = vld [vmem:[%s464_s5] sm:$0x1]  ;;  %s377_s5 = smov 96   ;;  %s203_s28 = sshll.u32 %s378_s27, 4  ;;  %s204_s28 = int_to_ptr.vmem [resolvable:$true] %s203_s28 }
  0x2d   :  { %246 = vmatpush3.msra.mxu0 %v79_v4  ;;  %s379_s29 = smov [#allocation10]   ;;  %s321_s8 = scalar_lea.vmem %s204_s28, 16 }
  0x2e   :  { %247 = vmatprep.subr.mxu0 %v373_v0  ;;  %s213_s30 = sshll.u32 %s379_s29, 4  ;;  %p322_p0 = scmp.ne.s32.totalorder %s204_s28, %s321_s8  ;;  %s214_s30 = int_to_ptr.vmem [resolvable:$true] %s213_s30 }
  0x2f   :  { %248 = vmatpush3.msra.mxu0 %v78_v6  ;;  %s325_s9 = scalar_lea.vmem %s204_s28, 32  ;;  %p326_p2 = scmp.lt.s32.totalorder %s204_s28, %s204_s28 }
  0x30   :  { %v66_v8 = vld [vmem:[#allocation10] sm:$0x1]  ;;  %249 = vmatprep.subr.mxu0 %v373_v0  ;;  %p327_p3 = scmp.lt.s32.totalorder %s325_s9, %s321_s8 }
  0x31   :  { %69 = vrot.lane.b32.xlu0 %v66_v8, %s375_s2  ;;  %250 = vmatpush3.msra.mxu0 %v77_v7  ;;  %v67_v11 = vld [vmem:[#allocation10 + $0x1] sm:$0x1] }
  0x32   :  { %251 = vmatprep.subr.mxu0 %v373_v0  ;;  %165 = vrot.lane.b32.xlu1 %v67_v11, %s375_s2  ;;  %p328_p4 = por %p327_p3, %p326_p2 }
  0x33   :  { %252 = vmatpush3.msra.mxu0 %v76_v9 }
  0x34   :  { %253 = vmatprep.subr.mxu0 %v373_v0  ;;  %p329_p5 = pnand %p328_p4, %p322_p0 }
  0x35   :  { %254 = vmatpush3.msra.mxu0 %v75_v10 }
  0x36   :  { %255 = vmatprep.subr.mxu0 %v373_v0 }
  0x37   :  { %256 = vmatpush3.msra.mxu0 %v74_v12 }
  0xa3   :  { %v70_v14 = vpop.permute.xlu0 %69 }
  0xa4   :  { %v73_v15 = vsel %vm72_vm2, %v65_v13, %v70_v14  ;;  %v166_v27 = vpop.permute.xlu1 %165 }
  0xa5   :  { %258 = vmatmul.mubr.msk.f32.vlgmr.msra.gmra.mxu0 %vm83_vm3, %v73_v15 }
 0x165   :  { %v153_v17 = vpop.f32.mrf.mxu0 }
 0x166   :  { %v154_v18 = vadd.f32 %v153_v17, %v82_v16 }
 0x167   :  { %v259_v19 = vpop.f32.mrf.mxu0 }
 0x168   :  { %271 = vtanh.f32 %v154_v18  ;;  %v231_v21 = vmul.f32 -1.442695, %v154_v18 }
 0x16a   :  { %273 = vpow2.f32 %v231_v21 }
 0x175   :  { %v272_v20 = vpop.eup %271 }
 0x176   :  { %170 = vrot.lane.b32.xlu0 %v272_v20, %s376_s26 }
 0x177   :  { %v274_v22 = vpop.eup %273 }
 0x178   :  { %v160_v23 = vadd.f32 1.0, %v274_v22 }
 0x17a   :  { %275 = vrcp.f32 %v160_v23 }
 0x187   :  { %v276_v24 = vpop.eup %275 }
 0x188   :  { %v168_v28 = vmul.f32 %v276_v24, %v166_v27 }
 0x1e8   :  { %v171_v25 = vpop.permute.xlu0 %170 }
 0x1e9   :  { %v173_v26 = vmul.f32 %v276_v24, %v171_v25 }
 0x1eb   :  { %175 = vrot.lane.b32.xlu1 %v173_v26, %s375_s2 }
 0x25d   :  { %v176_v29 = vpop.permute.xlu1 %175 }
 0x25e   :  { %v178_v30 = vadd.f32 %v176_v29, %v168_v28 }
 0x260   :  { %277 = vtanh.f32 %v178_v30 }
 0x26d   :  { %v278_v31 = vpop.eup %277 }
 0x26e   :  { %181 = vrot.lane.b32.xlu0 %v278_v31, %s376_s26 }
 0x272   :  { %193 = vrot.lane.b32.xlu0 %v178_v30, %s377_s5 }
 0x2e0   :  { %v182_v32 = vpop.permute.xlu0 %181 }
 0x2e1   :  { %v184_v33 = vmul.f32 %v276_v24, %v182_v32 }
 0x2e3   :  { %186 = vrot.lane.b32.xlu1 %v184_v33, %s375_s2 }
 0x2e4   :  { %v194_v34 = vpop.permute.xlu0 %193 }
 0x2e5   :  { %196 = vst.msk [vmem:[#allocation10 + $0x1] sm:$0x1] %vm61_vm1, %v194_v34 }
 0x355   :  { %v187_v35 = vpop.permute.xlu1 %186 }
 0x356   :  { %190 = vst.msk [vmem:[#allocation9] sm:$0x1] %vm61_vm1, %v187_v35  ;;  %191 = vst.msk [vmem:[#allocation10] sm:$0x1] %vm61_vm1, %v187_v35 }
 0x357   :  { %332 = shalt.err (!%p329_p5)
}
 0x358   :  { %206 = dma.vmem_to_hbm [thread:$0]  %s204_s28, 16, %s465_s6, [#allocation6]  }
 0x359   :  { %s341_s12 = scalar_lea.vmem %s214_s30, 32  ;;  %p346_p7 = scmp.lt.s32.totalorder %s214_s30, %s214_s30 }
 0x35a   :  { %p342_p6 = scmp.ne.s32.totalorder %s214_s30, %s341_s12  ;;  %p347_p8 = scmp.lt.s32.totalorder %s341_s12, %s341_s12 }
 0x35c   :  { %p348_p9 = por %p347_p8, %p346_p7 }
 0x35e   :  { %p349_p10 = pnand %p348_p9, %p342_p6 }
 0x360   :  { %352 = shalt.err (!%p349_p10)
}
 0x361   :  { %216 = dma.vmem_to_hbm [thread:$0]  %s214_s30, 32, %s466_s7, [#allocation11]  }
 0x362   :  { %365 = dma.done.wait [#allocation6], 16  }
 0x363   :  { %366 = vsyncadd [#allocation6], 4294967280 }
 0x364   :  { %367 = dma.done.wait [#allocation11], 32  }
 0x365   :  { %368 = vsyncadd [#allocation11], 4294967264 }
 0x366   :  { %223 = vsyncpa [#allocation5], 1 }
 0x367   :  { %224 = vsyncpa [#allocation8], 1 }
 0x368   :  { %225 = vsyncpa [#allocation6], 1 }
 0x369   :  { %226 = vsyncpa [#allocation11], 1 }

</bundles_post_ra>
